<compile_context>
chip_gen: v5e
topology: v5e:2x2
jax: 0.10.0
libtpu: 0.0.40
codegen_flags: <defaults>
</compile_context>

<pallas_src>
import math

import jax
import jax.numpy as jnp
from jax.experimental import pallas as pl
from jax.experimental.pallas import tpu as pltpu


_MIN_GRID_STEPS = 4          # aim for >=4 row-steps -> v7x megacore + pipelining
_MIN_TILE_BYTES = 1 << 20    # never shrink a tile below ~1 MiB (85%+ roofline)
_BUDGET_CACHE = None


def _cdiv(a, b):
    return -(-a // b)


def _round_up(x, m):
    return ((x + m - 1) // m) * m


def _sublane(dtype):
    # f32 -> 8, bf16 -> 16, int8/fp8 -> 32 (sublane packing)
    return max(8, 32 // jnp.dtype(dtype).itemsize)


def _tpu_budget():
    """(target_tile_bytes, vmem_limit_cap) gated on the part's physical VMEM."""
    global _BUDGET_CACHE
    if _BUDGET_CACHE is not None:
        return _BUDGET_CACHE
    vmem = 0
    try:
        info = pltpu.get_tpu_info()
        vmem = int(getattr(info, "vmem_capacity_bytes", 0) or 0)
    except Exception:
        vmem = 0
    if vmem >= (100 << 20):                  # 128 MiB VMEM parts: v5e / v6e
        _BUDGET_CACHE = (8 << 20, 80 << 20)
    else:                                    # v7x (64 MiB) or unknown: stay safe
        _BUDGET_CACHE = (4 << 20, 40 << 20)
    return _BUDGET_CACHE


def _pick_tiles(n_rows, width, dtype):
    """Pick (tm, tn) row/lane tiles for a (n_rows, width) streaming op."""
    itemsize = jnp.dtype(dtype).itemsize
    sub = _sublane(dtype)
    target_bytes, _ = _tpu_budget()

    # Lane tile: keep the full row unless even a sublane-high slab blows the
    # budget; then tile lanes in multiples of 128 (keeps stores unmasked).
    if width * sub * itemsize > target_bytes and width > 128:
        tn = max(128, (target_bytes // (sub * itemsize * 128)) * 128)
    else:
        tn = width

    # Row tile from the byte budget.
    tm = max(1, target_bytes // max(1, tn * itemsize))
    tm = max(sub, (tm // sub) * sub)

    # Keep >= _MIN_GRID_STEPS row steps when the data is big enough (v7x has
    # 2 TensorCores; a single tile leaves one idle), but never shrink a tile
    # below ~1 MiB (per-grid-step overhead amortization).
    floor_rows = max(sub, _round_up(_cdiv(_MIN_TILE_BYTES, max(1, tn * itemsize)), sub))
    steps_rows = max(sub, _round_up(_cdiv(max(n_rows, 1), _MIN_GRID_STEPS), sub))
    tm = min(tm, max(floor_rows, steps_rows))

    tm = min(tm, _round_up(max(n_rows, 1), sub))
    return tm, tn


def _vmem_limit(tm, tn, dtype):
    itemsize = jnp.dtype(dtype).itemsize
    io_tile = tm * tn * itemsize
    f32_tile = tm * tn * 4
    wb_bytes = 4 * tn * itemsize + 2 * tn * 4       # w/b rows (double-buffered) + upcasts
    # x + out double-buffered, f32 compute intermediates, w/b, headroom.
    need = 4 * io_tile + 2 * f32_tile + wb_bytes + (2 << 20)
    _, cap = _tpu_budget()
    return int(min(cap, max(16 << 20, need)))


# ----------------------------------------------------------------------------
# kernel body (shared): weight/bias broadcast via jnp semantics
#   row-broadcast : w/b blocks are (1, tn)   (channels_last, NCHW small-HW)
#   col-broadcast : w/b blocks are (tm, 1)   (channels_first, HW >= 128)
# ----------------------------------------------------------------------------
def _dyt_kernel(alpha_ref, x_ref, w_ref, b_ref, o_ref):
    a = alpha_ref[0]                                  # f32 scalar from SMEM
    x = x_ref[...].astype(jnp.float32)
    w = w_ref[...].astype(jnp.float32)
    b = b_ref[...].astype(jnp.float32)
    o_ref[...] = (jnp.tanh(a * x) * w + b).astype(o_ref.dtype)


def _launch(x2, w2, b2, alpha_s, *, row_bcast):
    M, Wd = x2.shape
    dtype = x2.dtype
    tm, tn = _pick_tiles(M, Wd, dtype)
    grid = (_cdiv(M, tm), _cdiv(Wd, tn))              # ragged final blocks masked by Pallas

    if row_bcast:
        w_spec = pl.BlockSpec((1, tn), lambda i, j: (0, j))
        b_spec = pl.BlockSpec((1, tn), lambda i, j: (0, j))
    else:
        w_spec = pl.BlockSpec((tm, 1), lambda i, j: (i, 0))
        b_spec = pl.BlockSpec((tm, 1), lambda i, j: (i, 0))

    return pl.pallas_call(
        _dyt_kernel,
        out_shape=jax.ShapeDtypeStruct((M, Wd), dtype),
        grid_spec=pltpu.PrefetchScalarGridSpec(
            num_scalar_prefetch=0,
            grid=grid,
            in_specs=[
                pl.BlockSpec(memory_space=pltpu.MemorySpace.SMEM),   # alpha
                pl.BlockSpec((tm, tn), lambda i, j: (i, j)),         # x tile
                w_spec,                                              # weight
                b_spec,                                              # bias
            ],
            out_specs=pl.BlockSpec((tm, tn), lambda i, j: (i, j)),
        ),
        compiler_params=pltpu.CompilerParams(
            dimension_semantics=("parallel", "parallel"),
            vmem_limit_bytes=_vmem_limit(tm, tn, dtype),
        ),
    )(alpha_s, x2, w2, b2)


# ----------------------------------------------------------------------------
# channels_last: x is (..., C), weight/bias are (C,)
# ----------------------------------------------------------------------------
def dynamic_tanh_channels_last(x, alpha, weight, bias):
    orig_shape = x.shape
    C = orig_shape[-1]
    M = math.prod(orig_shape[:-1]) if len(orig_shape) > 1 else 1
    # NOTE: alpha is a scalar parameter (torch.ones(1) * alpha_init); only
    # alpha[0] is used, matching the reference module.
    alpha_s = alpha.reshape(-1).astype(jnp.float32)

    # Lane-fold small channel dims so the output row width is a multiple of 128
    # (fully unmasked vector stores — the biggest measured lever).
    k = 1 if C >= 128 else (128 // math.gcd(C, 128))
    Wd = k * C

    x2 = x.reshape(M, C)
    Mp = _round_up(max(M, 1), k)          # pad only the fold remainder (<= k-1 rows)
    if Mp != M:
        x2 = jnp.pad(x2, ((0, Mp - M), (0, 0)))
    Mf = Mp // k
    x2 = x2.reshape(Mf, Wd)

    w2 = jnp.tile(weight.reshape(-1), (k,)).reshape(1, Wd)
    b2 = jnp.tile(bias.reshape(-1), (k,)).reshape(1, Wd)

    out = _launch(x2, w2, b2, alpha_s, row_bcast=True)

    if Mp != M:
        out = out.reshape(Mp, C)[:M]
    return out.reshape(orig_shape)


# ----------------------------------------------------------------------------
# channels_first: x is (N, C, H, W), weight/bias are (C,)
# ----------------------------------------------------------------------------
def dynamic_tanh_channels_first(x, alpha, weight, bias):
    N, C, H, W = x.shape
    HW = H * W
    alpha_s = alpha.reshape(-1).astype(jnp.float32)

    if HW >= 128:
        # Lane-dense spatial rows: (N*C, H*W) with per-row (tm, 1) weight cols.
        R = N * C
        x2 = x.reshape(R, HW)
        w2 = jnp.tile(weight.reshape(-1), (N,)).reshape(R, 1)   # row r -> weight[r % C]
        b2 = jnp.tile(bias.reshape(-1), (N,)).reshape(R, 1)
        out = _launch(x2, w2, b2, alpha_s, row_bcast=False)
        return out.reshape(N, C, H, W)

    # Small spatial dims would make (N*C, HW) stores lane-sparse; instead use
    # whole-image rows (N, C*H*W) with a (1, C*H*W) weight row (weight[c]
    # repeated HW times).  Pure reshape — no HBM copy of x.
    x2 = x.reshape(N, C * HW)
    w2 = jnp.repeat(weight.reshape(-1), HW).reshape(1, C * HW)
    b2 = jnp.repeat(bias.reshape(-1), HW).reshape(1, C * HW)
    out = _launch(x2, w2, b2, alpha_s, row_bcast=True)
    return out.reshape(N, C, H, W)


# ----------------------------------------------------------------------------
# reference (pure JAX) for verification
# ----------------------------------------------------------------------------
def _ref(x, alpha, weight, bias, channels_last):
    y = jnp.tanh(alpha * x.astype(jnp.float32))
    if channels_last:
        return y * weight + bias
    return y * weight[:, None, None] + bias[:, None, None]


if __name__ == "__main__":
    key = jax.random.PRNGKey(0)
    k1, k2, k3, k4, k5, k6 = jax.random.split(key, 6)

    alpha_init_value = 0.5
    alpha = jnp.ones((1,), jnp.float32) * alpha_init_value

    # ---- channels_first (NCHW, HW >= 128): normalized_shape = C ----
    N, C, H, W = 2, 4, 16, 16
    x_cf = jax.random.normal(k1, (N, C, H, W), dtype=jnp.float32)
    weight_cf = 1.0 + 0.1 * jax.random.normal(k2, (C,), dtype=jnp.float32)
    bias_cf = 0.1 * jax.random.normal(k3, (C,), dtype=jnp.float32)
    out_cf = dynamic_tanh_channels_first(x_cf, alpha, weight_cf, bias_cf)
    jax.block_until_ready(out_cf)
    ref_cf = _ref(x_cf, alpha, weight_cf, bias_cf, channels_last=False)
    assert jnp.allclose(out_cf, ref_cf, atol=1e-5, rtol=1e-5)

    # ---- channels_first, small spatial dims (HW < 128 -> image-row path) ----
    x_cs = jax.random.normal(k4, (2, 32, 4, 4), dtype=jnp.float32)
    w_cs = 1.0 + 0.1 * jax.random.normal(k5, (32,), dtype=jnp.float32)
    b_cs = 0.1 * jax.random.normal(k6, (32,), dtype=jnp.float32)
    out_cs = dynamic_tanh_channels_first(x_cs, alpha, w_cs, b_cs)
    jax.block_until_ready(out_cs)
    ref_cs = _ref(x_cs, alpha, w_cs, b_cs, channels_last=False)
    assert jnp.allclose(out_cs, ref_cs, atol=1e-5, rtol=1e-5)

    # ---- channels_last (B, S, D): normalized_shape = D ----
    B, S, D = 2, 8, 32
    x_cl = jax.random.normal(k4, (B, S, D), dtype=jnp.float32)
    weight_cl = 1.0 + 0.1 * jax.random.normal(k5, (D,), dtype=jnp.float32)
    bias_cl = 0.1 * jax.random.normal(k6, (D,), dtype=jnp.float32)
    out_cl = dynamic_tanh_channels_last(x_cl, alpha, weight_cl, bias_cl)
    jax.block_until_ready(out_cl)
    ref_cl = _ref(x_cl, alpha, weight_cl, bias_cl, channels_last=True)
    assert jnp.allclose(out_cl, ref_cl, atol=1e-5, rtol=1e-5)

    # ---- channels_last, awkward shape (exercises fold-remainder pad) ----
    x_awk = jax.random.normal(k1, (2, 7, 48), dtype=jnp.float32)
    w_awk = 1.0 + 0.1 * jax.random.normal(k2, (48,), dtype=jnp.float32)
    b_awk = 0.1 * jax.random.normal(k3, (48,), dtype=jnp.float32)
    out_awk = dynamic_tanh_channels_last(x_awk, alpha, w_awk, b_awk)
    jax.block_until_ready(out_awk)
    ref_awk = _ref(x_awk, alpha, w_awk, b_awk, channels_last=True)
    assert jnp.allclose(out_awk, ref_awk, atol=1e-5, rtol=1e-5)

    # ---- channels_last, bf16 HBM traffic (compute upcast to f32 in kernel) ----
    x_bf = jax.random.normal(k1, (2, 16, 256), dtype=jnp.float32).astype(jnp.bfloat16)
    w_bf = (1.0 + 0.1 * jax.random.normal(k2, (256,), jnp.float32)).astype(jnp.bfloat16)
    b_bf = (0.1 * jax.random.normal(k3, (256,), jnp.float32)).astype(jnp.bfloat16)
    out_bf = dynamic_tanh_channels_last(x_bf, alpha, w_bf, b_bf)
    jax.block_until_ready(out_bf)
    ref_bf = _ref(x_bf.astype(jnp.float32), alpha,
                  w_bf.astype(jnp.float32), b_bf.astype(jnp.float32),
                  channels_last=True)
    assert jnp.allclose(out_bf.astype(jnp.float32), ref_bf, atol=2e-2, rtol=2e-2)

    print("KERNEL_OK")
</pallas_src>

<mosaic_0001>
module attributes {stable_mosaic.version = 11 : i64} {
  func.func @_dyt_kernel(%arg0: i32, %arg1: i32, %arg2: memref<1xf32, #tpu.memory_space<smem>>, %arg3: memref<8x256xf32, #tpu.memory_space<vmem>>, %arg4: memref<8x1xf32, #tpu.memory_space<vmem>>, %arg5: memref<8x1xf32, #tpu.memory_space<vmem>>, %arg6: memref<8x256xf32, #tpu.memory_space<vmem>>) attributes {dimension_semantics = [#tpu.dimension_semantics<parallel>, #tpu.dimension_semantics<parallel>], iteration_bounds = array<i64: 1, 1>, scalar_prefetch = 0 : i64, scratch_operands = 0 : i64, tpu.core_type = #tpu.core_type<tc>, window_params = [{transform_indices = @transform_0, window_bounds = array<i64: 1>}, {transform_indices = @transform_1, window_bounds = array<i64: 8, 256>}, {transform_indices = @transform_2, window_bounds = array<i64: 8, 1>}, {transform_indices = @transform_3, window_bounds = array<i64: 8, 1>}, {transform_indices = @transform_4, window_bounds = array<i64: 8, 256>}]} {
    %c0 = arith.constant 0 : index
    %0 = memref.load %arg2[%c0] : memref<1xf32, #tpu.memory_space<smem>>
    %c0_0 = arith.constant 0 : index
    %c0_1 = arith.constant 0 : index
    %1 = vector.load %arg3[%c0_0, %c0_1] : memref<8x256xf32, #tpu.memory_space<vmem>>, vector<8x256xf32>
    %c0_2 = arith.constant 0 : index
    %c0_3 = arith.constant 0 : index
    %2 = vector.load %arg4[%c0_2, %c0_3] : memref<8x1xf32, #tpu.memory_space<vmem>>, vector<8x1xf32>
    %c0_4 = arith.constant 0 : index
    %c0_5 = arith.constant 0 : index
    %3 = vector.load %arg5[%c0_4, %c0_5] : memref<8x1xf32, #tpu.memory_space<vmem>>, vector<8x1xf32>
    %4 = vector.broadcast %0 : f32 to vector<8x256xf32>
    %5 = arith.mulf %4, %1 : vector<8x256xf32>
    %6 = math.tanh %5 : vector<8x256xf32>
    %7 = vector.broadcast %2 : vector<8x1xf32> to vector<8x256xf32>
    %8 = arith.mulf %6, %7 : vector<8x256xf32>
    %9 = vector.broadcast %3 : vector<8x1xf32> to vector<8x256xf32>
    %10 = arith.addf %8, %9 : vector<8x256xf32>
    %c0_6 = arith.constant 0 : index
    %c0_7 = arith.constant 0 : index
    %11 = vector.load %arg6[%c0_6, %c0_7] : memref<8x256xf32, #tpu.memory_space<vmem>>, vector<8x256xf32>
    tpu.vector_store %arg6[%c0_6, %c0_7], %10 {strides = array<i32>} : memref<8x256xf32, #tpu.memory_space<vmem>>, vector<8x256xf32>,
    return
  }
  func.func @transform_0(%arg0: i32, %arg1: i32) -> i32 {
    %c0_i32 = arith.constant 0 : i32
    %c0_i32_0 = arith.constant 0 : i32
    return %c0_i32 : i32
  }
  func.func @transform_1(%arg0: i32, %arg1: i32) -> (i32, i32) {
    %c0_i32 = arith.constant 0 : i32
    return %arg0, %arg1 : i32, i32
  }
  func.func @transform_2(%arg0: i32, %arg1: i32) -> (i32, i32) {
    %c0_i32 = arith.constant 0 : i32
    %c0_i32_0 = arith.constant 0 : i32
    return %arg0, %c0_i32 : i32, i32
  }
  func.func @transform_3(%arg0: i32, %arg1: i32) -> (i32, i32) {
    %c0_i32 = arith.constant 0 : i32
    %c0_i32_0 = arith.constant 0 : i32
    return %arg0, %c0_i32 : i32, i32
  }
  func.func @transform_4(%arg0: i32, %arg1: i32) -> (i32, i32) {
    %c0_i32 = arith.constant 0 : i32
    return %arg0, %arg1 : i32, i32
  }
}

</mosaic_0001>

<bundles_post_ra>
// kernel: tpu_custom_call.1
= control target key start
LH: loop header
LB: loop body
LE: loop exit
PB: predicated region body
PF: predicated region fallthrough
CT: control target
= control target key end

     0   :  { %s139_s0 = inlined_call_operand.<no memory space> [shape: f32[1], index: 0, kind: input, shape index: {}]   ;;  %s140_s1 = inlined_call_operand.vmem [shape: f32[8,256], index: 1, kind: input, shape index: {}]   ;;  %s141_s2 = inlined_call_operand.vmem [shape: f32[8,1], index: 2, kind: input, shape index: {}]   ;;  %s142_s3 = inlined_call_operand.vmem [shape: f32[8,1], index: 3, kind: input, shape index: {}]   ;;  %s143_s4 = inlined_call_operand.hbm [shape: f32[8,256], index: 4, kind: output, shape index: {}]  }
   0x1   :  { %v22_v0 = vld [vmem:[%s141_s2] sm:$0xff] }
   0x2   :  { %10 = vsyncpa [#allocation4], 0  ;;  %v94_v1 = vmov 0   ;;  %v23_v2 = vld [vmem:[%s142_s3] sm:$0xff]  ;;  %v24_v3 = vstv %s139_s0  ;;  %v21_v5 = vld [vmem:[%s140_s1 + $0x8] sm:$0xff]  ;;  %s95_s2 = smov [#allocation3]  }
   0x3   :  { %63 = vset.pattern.permute.xlu0 %v94_v1  ;;  %v20_v4 = vld [vmem:[%s140_s1] sm:$0xff]  ;;  %v26_v7 = vmul.f32 %v24_v3, %v21_v5  ;;  %s50_s3 = sshll.u32 %s95_s2, 4  ;;  %s52_s26 = sshll.u32 %s143_s4, 4  ;;  %s51_s3 = int_to_ptr.vmem [resolvable:$true] %s50_s3  ;;  %s53_s26 = int_to_ptr.hbm [resolvable:$true] %s52_s26 }
   0x4   :  { %31 = vperm.xlu0 %63, %v22_v0   ;;  %v25_v6 = vmul.f32 %v24_v3, %v20_v4 }
   0x6   :  { %64 = vtanh.f32 %v25_v6 }
   0x7   :  { %66 = vtanh.f32 %v26_v7 }
   0xc   :  { %38 = vperm.xlu0 %63, %v23_v2   ;;  %v65_v9 = vpop.eup %64 }
   0xd   :  { %v67_v10 = vpop.eup %66 }
  0x76   :  { %v32_v8 = vpop.permute.xlu0 %31 }
  0x77   :  { %v34_v11 = vmul.f32 %v65_v9, %v32_v8  ;;  %v35_v12 = vmul.f32 %v67_v10, %v32_v8 }
  0x7e   :  { %v39_v13 = vpop.permute.xlu0 %38 }
  0x7f   :  { %v41_v14 = vadd.f32 %v39_v13, %v34_v11  ;;  %v42_v15 = vadd.f32 %v39_v13, %v35_v12 }
  0x81   :  { %43 = vst [vmem:[#allocation3] sm:$0xff] %v41_v14 }
  0x82   :  { %44 = vst [vmem:[#allocation3 + $0x8] sm:$0xff] %v42_v15 }
  0x83   :  { %55 = dma.vmem_to_hbm [thread:$0]  %s51_s3, 256, %s53_s26, [#allocation4]  }
  0x84   :  { %92 = dma.done.wait [#allocation4], 256  }
  0x85   :  { %93 = vsyncadd [#allocation4], 4294967040 }
  0x86   :  { %60 = vsyncpa [#allocation4], 1 }

</bundles_post_ra>
